<compile_context>
chip_gen: v6e
topology: v6e:2x2x1
jax: 0.10.0
libtpu: 0.0.40
codegen_flags: <defaults>
</compile_context>

<pallas_src>
import jax
import jax.numpy as jnp
from jax import lax
from jax.experimental import pallas as pl
from jax.experimental.pallas import tpu as pltpu

# Problem sizes (small, consistent with the module: NHWC image obs).
B, H, W, C = 2, 16, 16, 4
F_CONV = 32          # conv output channels
D_OUT = 64           # encoder feature dim
KH = KW = 3
PAD = 1


def encoder_kernel(p_ref, wc_ref, bc_ref, wl_ref, bl_ref, o_ref):
    # p_ref : (B_TILE*H*W, KH*KW*C)  bf16 im2col patches (raw 0..255 pixels)
    # wc_ref: (KH*KW*C, F_CONV)      f32 conv weights, pre-scaled by 1/255
    # bc_ref: (1, F_CONV)            conv bias
    # wl_ref: (F_CONV, D_OUT)        linear weights
    # bl_ref: (1, D_OUT)             linear bias
    # o_ref : (B_TILE, D_OUT)        encoder features for this batch tile
    bt, _ = o_ref.shape
    rows = p_ref.shape[0]
    hw = rows // bt                                   # spatial positions / image

    p = p_ref[...].astype(jnp.float32)                # exact bf16 -> f32 upcast

    # Fused conv (im2col matmul, /255 folded into weights) + bias + ReLU.
    acc = jnp.dot(p, wc_ref[...], preferred_element_type=jnp.float32)
    acc = jnp.maximum(acc + bc_ref[...], 0.0)         # (rows, F_CONV)

    # Global average pool per image, done on the MXU with a block-diagonal
    # averaging matrix (keeps the serial epilogue off the XLU/VALU path).
    row_id = lax.broadcasted_iota(jnp.int32, (bt, rows), 0)
    col_id = lax.broadcasted_iota(jnp.int32, (bt, rows), 1)
    start = row_id * hw
    in_img = (col_id >= start) & (col_id < start + hw)
    pool = jnp.where(in_img, 1.0 / hw, 0.0)           # (bt, rows)
    pooled = jnp.dot(pool, acc, preferred_element_type=jnp.float32)  # (bt, F)

    # Final linear + ReLU, whole batch-tile output written as one slab.
    hid = jnp.dot(pooled, wl_ref[...],
                  preferred_element_type=jnp.float32) + bl_ref[...]
    o_ref[...] = jnp.maximum(hid, 0.0)                # (bt, D_OUT)


def encoder_obs_wrapper(obs, wc, bc, wl, bl, *, b_tile=None):
    """obs: (B, H, W, C) uint8 image observation (NHWC)."""
    b, h, w, c = obs.shape
    kh_, kw_, _, f = wc.shape
    d_out = wl.shape[1]
    if b_tile is None:
        b_tile = b                                    # whole batch in one step
    nb = b // b_tile
    rows_per_block = b_tile * h * w
    k = kh_ * kw_ * c

    # im2col on the narrow dtype: pure layout plumbing, no arithmetic.
    # Row ordering (kh, kw, c) matches wc.reshape(KH*KW*C, F).
    xp = jnp.pad(obs, ((0, 0), (PAD, PAD), (PAD, PAD), (0, 0)))
    taps = [xp[:, i:i + h, j:j + w, :] for i in range(kh_) for j in range(kw_)]
    patches = jnp.stack(taps, axis=3).reshape(b * h * w, k)
    patches = patches.astype(jnp.bfloat16)            # 0..255 exact in bf16

    # Fold the /255.0 normalization into the (tiny) conv weights — linear op,
    # mathematically identical to normalizing the input.
    wc_fused = (wc * (1.0 / 255.0)).reshape(k, f).astype(jnp.float32)

    out = pl.pallas_call(
        encoder_kernel,
        out_shape=jax.ShapeDtypeStruct((b, d_out), jnp.float32),
        grid_spec=pl.GridSpec(
            grid=(nb,),
            in_specs=[
                pl.BlockSpec((rows_per_block, k), lambda i: (i, 0)),
                pl.BlockSpec((k, f), lambda i: (0, 0)),
                pl.BlockSpec((1, f), lambda i: (0, 0)),
                pl.BlockSpec((f, d_out), lambda i: (0, 0)),
                pl.BlockSpec((1, d_out), lambda i: (0, 0)),
            ],
            out_specs=pl.BlockSpec((b_tile, d_out), lambda i: (i, 0)),
        ),
        compiler_params=pltpu.CompilerParams(
            # Batch-tile axis is independent -> shard across v7x's 2 TCs when
            # nb > 1; neutral on single-TC v5e/v6e.
            dimension_semantics=("parallel",)),
    )(patches, wc_fused, bc, wl, bl)
    return out                                        # (B, D_OUT)


def reference(obs, wc, bc, wl, bl):
    """Pure-JAX reference of the same forward pass (for correctness check)."""
    x = obs.astype(jnp.float32) / 255.0               # NHWC
    y = lax.conv_general_dilated(
        x, wc, window_strides=(1, 1), padding=((PAD, PAD), (PAD, PAD)),
        dimension_numbers=("NHWC", "HWIO", "NHWC"),
        precision=lax.Precision.HIGHEST)
    y = jnp.maximum(y + bc[0], 0.0)                   # conv bias + ReLU
    pooled = jnp.mean(y, axis=(1, 2))                 # (B, F)
    hid = jnp.maximum(
        jnp.dot(pooled, wl, precision=lax.Precision.HIGHEST) + bl[0], 0.0)
    return hid                                        # (B, D)


if __name__ == "__main__":
    key = jax.random.PRNGKey(0)
    k_obs, k_wc, k_bc, k_wl, k_bl = jax.random.split(key, 5)

    obs = jax.random.randint(k_obs, (B, H, W, C), 0, 256, dtype=jnp.int32)
    obs = obs.astype(jnp.uint8)

    # Deterministic synthetic encoder parameters.
    wc = 0.1 * jax.random.normal(k_wc, (KH, KW, C, F_CONV), jnp.float32)
    bc = 0.1 * jax.random.normal(k_bc, (1, F_CONV), jnp.float32)
    wl = 0.1 * jax.random.normal(k_wl, (F_CONV, D_OUT), jnp.float32)
    bl = 0.1 * jax.random.normal(k_bl, (1, D_OUT), jnp.float32)

    out = jax.block_until_ready(encoder_obs_wrapper(obs, wc, bc, wl, bl))
    ref = jax.block_until_ready(reference(obs, wc, bc, wl, bl))

    assert out.shape == (B, D_OUT), out.shape
    max_err = float(jnp.max(jnp.abs(out - ref)))
    assert jnp.allclose(out, ref, rtol=1e-4, atol=1e-4), max_err
    print("KERNEL_OK")
</pallas_src>

<mosaic_0001>
module attributes {stable_mosaic.version = 11 : i64} {
  func.func @encoder_kernel(%arg0: i32, %arg1: memref<512x36xbf16, #tpu.memory_space<vmem>>, %arg2: memref<36x32xf32, #tpu.memory_space<vmem>>, %arg3: memref<1x32xf32, #tpu.memory_space<vmem>>, %arg4: memref<32x64xf32, #tpu.memory_space<vmem>>, %arg5: memref<1x64xf32, #tpu.memory_space<vmem>>, %arg6: memref<2x64xf32, #tpu.memory_space<vmem>>) attributes {dimension_semantics = [#tpu.dimension_semantics<parallel>], iteration_bounds = array<i64: 1>, scalar_prefetch = 0 : i64, scratch_operands = 0 : i64, tpu.core_type = #tpu.core_type<tc>, window_params = [{transform_indices = @transform_0, window_bounds = array<i64: 512, 36>}, {pipeline_mode = #tpu.pipeline_mode<synchronous>, transform_indices = @transform_1, window_bounds = array<i64: 36, 32>}, {pipeline_mode = #tpu.pipeline_mode<synchronous>, transform_indices = @transform_2, window_bounds = array<i64: 1, 32>}, {pipeline_mode = #tpu.pipeline_mode<synchronous>, transform_indices = @transform_3, window_bounds = array<i64: 32, 64>}, {pipeline_mode = #tpu.pipeline_mode<synchronous>, transform_indices = @transform_4, window_bounds = array<i64: 1, 64>}, {transform_indices = @transform_5, window_bounds = array<i64: 2, 64>}]} {
    %c0 = arith.constant 0 : index
    %c0_0 = arith.constant 0 : index
    %0 = vector.load %arg1[%c0, %c0_0] : memref<512x36xbf16, #tpu.memory_space<vmem>>, vector<512x36xbf16>
    %1 = arith.extf %0 : vector<512x36xbf16> to vector<512x36xf32>
    %c0_1 = arith.constant 0 : index
    %c0_2 = arith.constant 0 : index
    %2 = vector.load %arg2[%c0_1, %c0_2] : memref<36x32xf32, #tpu.memory_space<vmem>>, vector<36x32xf32>
    %cst = arith.constant dense<0.000000e+00> : vector<512x32xf32>
    %3 = tpu.matmul %1, %2, %cst {dimension_numbers = #tpu.dot_dimension_numbers<[1], [0], [0], [1], [0, 0, 1, 1], [], []>} : vector<512x36xf32>, vector<36x32xf32>, vector<512x32xf32> -> vector<512x32xf32>
    %c0_3 = arith.constant 0 : index
    %c0_4 = arith.constant 0 : index
    %4 = vector.load %arg3[%c0_3, %c0_4] : memref<1x32xf32, #tpu.memory_space<vmem>>, vector<1x32xf32>
    %5 = vector.broadcast %4 : vector<1x32xf32> to vector<512x32xf32>
    %6 = arith.addf %3, %5 : vector<512x32xf32>
    %cst_5 = arith.constant 0.000000e+00 : f32
    %7 = vector.broadcast %cst_5 : f32 to vector<512x32xf32>
    %8 = arith.maximumf %6, %7 : vector<512x32xf32>
    %9 = tpu.iota {dimensions = array<i32: 0>} : vector<2x512xi32>
    %10 = tpu.iota {dimensions = array<i32: 1>} : vector<2x512xi32>
    %c256_i32 = arith.constant 256 : i32
    %11 = vector.broadcast %c256_i32 : i32 to vector<2x512xi32>
    %12 = arith.muli %9, %11 : vector<2x512xi32>
    %13 = arith.cmpi sge, %10, %12 : vector<2x512xi32>
    %c256_i32_6 = arith.constant 256 : i32
    %14 = vector.broadcast %c256_i32_6 : i32 to vector<2x512xi32>
    %15 = arith.addi %12, %14 : vector<2x512xi32>
    %16 = arith.cmpi slt, %10, %15 : vector<2x512xi32>
    %17 = arith.andi %13, %16 : vector<2x512xi1>
    %cst_7 = arith.constant 3.906250e-03 : f32
    %cst_8 = arith.constant 0.000000e+00 : f32
    %18 = vector.broadcast %cst_7 : f32 to vector<2x512xf32>
    %19 = vector.broadcast %cst_8 : f32 to vector<2x512xf32>
    %20 = arith.select %17, %18, %19 : vector<2x512xi1>, vector<2x512xf32>
    %cst_9 = arith.constant dense<0.000000e+00> : vector<2x32xf32>
    %21 = tpu.matmul %20, %8, %cst_9 {dimension_numbers = #tpu.dot_dimension_numbers<[1], [0], [0], [1], [0, 0, 1, 1], [], []>} : vector<2x512xf32>, vector<512x32xf32>, vector<2x32xf32> -> vector<2x32xf32>
    %c0_10 = arith.constant 0 : index
    %c0_11 = arith.constant 0 : index
    %22 = vector.load %arg4[%c0_10, %c0_11] : memref<32x64xf32, #tpu.memory_space<vmem>>, vector<32x64xf32>
    %cst_12 = arith.constant dense<0.000000e+00> : vector<2x64xf32>
    %23 = tpu.matmul %21, %22, %cst_12 {dimension_numbers = #tpu.dot_dimension_numbers<[1], [0], [0], [1], [0, 0, 1, 1], [], []>} : vector<2x32xf32>, vector<32x64xf32>, vector<2x64xf32> -> vector<2x64xf32>
    %c0_13 = arith.constant 0 : index
    %c0_14 = arith.constant 0 : index
    %24 = vector.load %arg5[%c0_13, %c0_14] : memref<1x64xf32, #tpu.memory_space<vmem>>, vector<1x64xf32>
    %25 = vector.broadcast %24 : vector<1x64xf32> to vector<2x64xf32>
    %26 = arith.addf %23, %25 : vector<2x64xf32>
    %cst_15 = arith.constant 0.000000e+00 : f32
    %27 = vector.broadcast %cst_15 : f32 to vector<2x64xf32>
    %28 = arith.maximumf %26, %27 : vector<2x64xf32>
    %c0_16 = arith.constant 0 : index
    %c0_17 = arith.constant 0 : index
    %29 = vector.load %arg6[%c0_16, %c0_17] : memref<2x64xf32, #tpu.memory_space<vmem>>, vector<2x64xf32>
    tpu.vector_store %arg6[%c0_16, %c0_17], %28 {strides = array<i32>} : memref<2x64xf32, #tpu.memory_space<vmem>>, vector<2x64xf32>,
    return
  }
  func.func @transform_0(%arg0: i32) -> (i32, i32) {
    %c0_i32 = arith.constant 0 : i32
    %c0_i32_0 = arith.constant 0 : i32
    return %arg0, %c0_i32 : i32, i32
  }
  func.func @transform_1(%arg0: i32) -> (i32, i32) {
    %c0_i32 = arith.constant 0 : i32
    %c0_i32_0 = arith.constant 0 : i32
    %c0_i32_1 = arith.constant 0 : i32
    return %c0_i32, %c0_i32_0 : i32, i32
  }
  func.func @transform_2(%arg0: i32) -> (i32, i32) {
    %c0_i32 = arith.constant 0 : i32
    %c0_i32_0 = arith.constant 0 : i32
    %c0_i32_1 = arith.constant 0 : i32
    return %c0_i32, %c0_i32_0 : i32, i32
  }
  func.func @transform_3(%arg0: i32) -> (i32, i32) {
    %c0_i32 = arith.constant 0 : i32
    %c0_i32_0 = arith.constant 0 : i32
    %c0_i32_1 = arith.constant 0 : i32
    return %c0_i32, %c0_i32_0 : i32, i32
  }
  func.func @transform_4(%arg0: i32) -> (i32, i32) {
    %c0_i32 = arith.constant 0 : i32
    %c0_i32_0 = arith.constant 0 : i32
    %c0_i32_1 = arith.constant 0 : i32
    return %c0_i32, %c0_i32_0 : i32, i32
  }
  func.func @transform_5(%arg0: i32) -> (i32, i32) {
    %c0_i32 = arith.constant 0 : i32
    %c0_i32_0 = arith.constant 0 : i32
    return %arg0, %c0_i32 : i32, i32
  }
}

</mosaic_0001>

<bundles_post_ra>
// kernel: tpu_custom_call.1
= control target key start
LH: loop header
LB: loop body
LE: loop exit
PB: predicated region body
PF: predicated region fallthrough
CT: control target
= control target key end

     0   :  { %vm354_vm0 = vcmask 1043456   ;;  %vm161_vm1 = vcmask 293888   ;;  %s2043_s0 = inlined_call_operand.vmem [shape: bf16[512,36], index: 0, kind: input, shape index: {}]   ;;  %s2044_s1 = inlined_call_operand.vmem [shape: f32[36,32], index: 1, kind: input, shape index: {}]   ;;  %s2045_s2 = inlined_call_operand.vmem [shape: f32[1,32], index: 2, kind: input, shape index: {}]   ;;  %s2046_s3 = inlined_call_operand.vmem [shape: f32[32,64], index: 3, kind: input, shape index: {}]   ;;  %s2047_s4 = inlined_call_operand.vmem [shape: f32[1,64], index: 4, kind: input, shape index: {}]   ;;  %s2048_s5 = inlined_call_operand.hbm [shape: f32[2,64], index: 5, kind: output, shape index: {}]  }
   0x1   :  { %v153_v0 = vld [vmem:[%s2044_s1 + $0x20] sm:$0xf]  ;;  %v152_v1 = vld [vmem:[%s2044_s1 + $0x18] sm:$0xff]  ;;  %v151_v3 = vld [vmem:[%s2044_s1 + $0x10] sm:$0xff] }
   0x2   :  { %1449 = vmatprep.subr.msk.mxu0 %vm354_vm0, %v153_v0  ;;  %v1147_v2 = vld [vmem:[%s2043_s0] sm:$0xff]   ;;  %1566 = vmatprep.subr.msk.mxu1 %vm354_vm0, %v153_v0  ;;  %v150_v5 = vld [vmem:[%s2044_s1 + $0x8] sm:$0xff]  ;;  %v1295_v8 = vld [vmem:[%s2043_s0 + $0xb0] sm:$0xff]  }
   0x3   :  { %1450 = vmatpush3.msk.msra.mxu0 %vm354_vm0, %v153_v0  ;;  %v1148_v4 = vunpack.c.l.bf16 %v1147_v2  ;;  %1571 = vmatpush3.msk.msra.mxu1 %vm354_vm0, %v153_v0  ;;  %v1274_v6 = vld [vmem:[%s2043_s0 + $0x8] sm:$0xff]   ;;  %v149_v7 = vld [vmem:[%s2044_s1] sm:$0xff]  ;;  %v1149_v9 = vunpack.c.h.bf16 %v1147_v2  ;;  %v1296_v10 = vld [vmem:[%s2043_s0 + $0xb8] sm:$0xff]   ;;  %v1236_v13 = vunpack.c.l.bf16 %v1295_v8  ;;  %v1237_v14 = vunpack.c.h.bf16 %v1295_v8 }
   0x4   :  { %1451 = vmatprep.subr.mxu0 %v152_v1  ;;  %1567 = vmatprep.subr.mxu1 %v152_v1  ;;  %v1152_v11 = vunpack.c.l.bf16 %v1274_v6  ;;  %v1275_v12 = vld [vmem:[%s2043_s0 + $0x10] sm:$0xff]   ;;  %v1240_v15 = vunpack.c.l.bf16 %v1296_v10  ;;  %v1153_v16 = vunpack.c.h.bf16 %v1274_v6  ;;  %v1297_v17 = vld [vmem:[%s2043_s0 + $0xc0] sm:$0xff]  }
   0x5   :  { %1452 = vmatpush3.msra.mxu0 %v152_v1  ;;  %1459 = vmatprep.mubr.msk.f32.mxu0 %vm161_vm1, %v1148_v4  ;;  %v1156_v18 = vunpack.c.l.bf16 %v1275_v12 }
   0x6   :  { %1453 = vmatprep.subr.mxu0 %v151_v3  ;;  %1572 = vmatpush3.msra.mxu1 %v152_v1 }
   0x7   :  { %1454 = vmatpush3.msra.mxu0 %v151_v3  ;;  %1568 = vmatprep.subr.mxu1 %v151_v3 }
   0x8   :  { %1455 = vmatprep.subr.mxu0 %v150_v5  ;;  %1573 = vmatpush3.msra.mxu1 %v151_v3 }
   0x9   :  { %1456 = vmatpush3.msra.mxu0 %v150_v5  ;;  %1569 = vmatprep.subr.mxu1 %v150_v5 }
   0xa   :  { %1457 = vmatprep.subr.mxu0 %v149_v7  ;;  %1574 = vmatpush3.msra.mxu1 %v150_v5 }
   0xb   :  { %1458 = vmatpush3.msra.mxu0 %v149_v7  ;;  %1570 = vmatprep.subr.mxu1 %v149_v7 }
   0xc   :  { %1460 = vmatmul.mubr.msk.f32.vlgmr.msra.gmra.mxu0 %vm161_vm1, %v1149_v9  ;;  %1575 = vmatpush3.msra.mxu1 %v149_v7 }
   0xd   :  { %1462 = vmatprep.mubr.msk.f32.mxu0 %vm161_vm1, %v1152_v11  ;;  %1525 = vmatprep.mubr.msk.f32.mxu1 %vm161_vm1, %v1236_v13 }
   0xe   :  { %10 = vsyncpa [#allocation3], 0  ;;  %v1276_v19 = vld [vmem:[%s2043_s0 + $0x18] sm:$0xff]   ;;  %1526 = vmatmul.mubr.msk.f32.vlgmr.msra.gmra.mxu1 %vm161_vm1, %v1237_v14  ;;  %v1241_v20 = vunpack.c.h.bf16 %v1296_v10  ;;  %v1244_v21 = vunpack.c.l.bf16 %v1297_v17  ;;  %v1157_v22 = vunpack.c.h.bf16 %v1275_v12  ;;  %v1298_v23 = vld [vmem:[%s2043_s0 + $0xc8] sm:$0xff]   ;;  %v1245_v26 = vunpack.c.h.bf16 %v1297_v17  ;;  %s1605_s24 = smov [#allocation2]  }
   0xf   :  { %1528 = vmatprep.mubr.msk.f32.mxu1 %vm161_vm1, %v1240_v15  ;;  %v1160_v24 = vunpack.c.l.bf16 %v1276_v19  ;;  %v1277_v25 = vld [vmem:[%s2043_s0 + $0x20] sm:$0xff]   ;;  %v1248_v27 = vunpack.c.l.bf16 %v1298_v23  ;;  %v1161_v28 = vunpack.c.h.bf16 %v1276_v19  ;;  %v1299_v29 = vld [vmem:[%s2043_s0 + $0xd0] sm:$0xff]   ;;  %v1278_v31 = vld [vmem:[%s2043_s0 + $0x28] sm:$0xff]   ;;  %v1249_v32 = vunpack.c.h.bf16 %v1298_v23  ;;  %s1066_s25 = sshll.u32 %s1605_s24, 4  ;;  %s1067_s25 = int_to_ptr.vmem [resolvable:$true] %s1066_s25 }
  0x10   :  { %1463 = vmatmul.mubr.msk.f32.gmra.mxu0 %vm161_vm1, %v1153_v16  ;;  %v1164_v30 = vunpack.c.l.bf16 %v1277_v25  ;;  %v1252_v33 = vunpack.c.l.bf16 %v1299_v29  ;;  %v1165_v34 = vunpack.c.h.bf16 %v1277_v25  ;;  %v1300_v35 = vld [vmem:[%s2043_s0 + $0xd8] sm:$0xff]   ;;  %v1168_v36 = vunpack.c.l.bf16 %v1278_v31  ;;  %v1279_v37 = vld [vmem:[%s2043_s0 + $0x30] sm:$0xff]   ;;  %v1301_v41 = vld [vmem:[%s2043_s0 + $0xe0] sm:$0xff]   ;;  %p1585_p1 = scmp.lt.s32.totalorder %s1067_s25, %s1067_s25 }
  0x11   :  { %1465 = vmatprep.mubr.msk.f32.mxu0 %vm161_vm1, %v1156_v18  ;;  %v1253_v38 = vunpack.c.h.bf16 %v1299_v29  ;;  %v1256_v39 = vunpack.c.l.bf16 %v1300_v35  ;;  %v1169_v40 = vunpack.c.h.bf16 %v1278_v31  ;;  %v1172_v42 = vunpack.c.l.bf16 %v1279_v37  ;;  %v1280_v43 = vld [vmem:[%s2043_s0 + $0x38] sm:$0xff]   ;;  %v1302_v47 = vld [vmem:[%s2043_s0 + $0xe8] sm:$0xff]   ;;  %v1281_v49 = vld [vmem:[%s2043_s0 + $0x40] sm:$0xff]  }
  0x12   :  { %1529 = vmatmul.mubr.msk.f32.gmra.mxu1 %vm161_vm1, %v1241_v20  ;;  %v1257_v44 = vunpack.c.h.bf16 %v1300_v35  ;;  %v1260_v45 = vunpack.c.l.bf16 %v1301_v41  ;;  %v1173_v46 = vunpack.c.h.bf16 %v1279_v37  ;;  %v1176_v48 = vunpack.c.l.bf16 %v1280_v43  ;;  %v1303_v53 = vld [vmem:[%s2043_s0 + $0xf0] sm:$0xff]   ;;  %v1282_v55 = vld [vmem:[%s2043_s0 + $0x48] sm:$0xff]   ;;  %v1304_v59 = vld [vmem:[%s2043_s0 + $0xf8] sm:$0xff]  }
  0x13   :  { %1531 = vmatprep.mubr.msk.f32.mxu1 %vm161_vm1, %v1244_v21  ;;  %v1261_v50 = vunpack.c.h.bf16 %v1301_v41  ;;  %v1264_v51 = vunpack.c.l.bf16 %v1302_v47  ;;  %v1177_v52 = vunpack.c.h.bf16 %v1280_v43  ;;  %v1180_v54 = vunpack.c.l.bf16 %v1281_v49  ;;  %v1283_v61 = vld [vmem:[%s2043_s0 + $0x50] sm:$0xff]   ;;  %v1284_v2 = vld [vmem:[%s2043_s0 + $0x58] sm:$0xff]   ;;  %v1285_v6 = vld [vmem:[%s2043_s0 + $0x60] sm:$0xff]  }
  0x14   :  { %1466 = vmatmul.mubr.msk.f32.gmra.mxu0 %vm161_vm1, %v1157_v22  ;;  %v1265_v56 = vunpack.c.h.bf16 %v1302_v47  ;;  %v1268_v57 = vunpack.c.l.bf16 %v1303_v53  ;;  %v1181_v58 = vunpack.c.h.bf16 %v1281_v49  ;;  %v1184_v60 = vunpack.c.l.bf16 %v1282_v55  ;;  %v1286_v9 = vld [vmem:[%s2043_s0 + $0x68] sm:$0xff]   ;;  %v1287_v12 = vld [vmem:[%s2043_s0 + $0x70] sm:$0xff]   ;;  %v1288_v15 = vld [vmem:[%s2043_s0 + $0x78] sm:$0xff]  }
  0x15   :  { %1468 = vmatprep.mubr.msk.f32.mxu0 %vm161_vm1, %v1160_v24  ;;  %v1269_v62 = vunpack.c.h.bf16 %v1303_v53  ;;  %v1272_v63 = vunpack.c.l.bf16 %v1304_v59  ;;  %v1185_v0 = vunpack.c.h.bf16 %v1282_v55  ;;  %v1188_v1 = vunpack.c.l.bf16 %v1283_v61  ;;  %v1289_v18 = vld [vmem:[%s2043_s0 + $0x80] sm:$0xff]   ;;  %v1290_v21 = vld [vmem:[%s2043_s0 + $0x88] sm:$0xff]   ;;  %v1291_v24 = vld [vmem:[%s2043_s0 + $0x90] sm:$0xff]  }
  0x16   :  { %1532 = vmatmul.mubr.msk.f32.gmra.mxu1 %vm161_vm1, %v1245_v26  ;;  %v1273_v3 = vunpack.c.h.bf16 %v1304_v59  ;;  %v1189_v4 = vunpack.c.h.bf16 %v1283_v61  ;;  %v1192_v5 = vunpack.c.l.bf16 %v1284_v2  ;;  %v1193_v7 = vunpack.c.h.bf16 %v1284_v2 }
  0x17   :  { %1534 = vmatprep.mubr.msk.f32.mxu1 %vm161_vm1, %v1248_v27  ;;  %v1196_v8 = vunpack.c.l.bf16 %v1285_v6  ;;  %v1197_v10 = vunpack.c.h.bf16 %v1285_v6  ;;  %v1200_v11 = vunpack.c.l.bf16 %v1286_v9  ;;  %v1201_v13 = vunpack.c.h.bf16 %v1286_v9  ;;  %v1292_v27 = vld [vmem:[%s2043_s0 + $0x98] sm:$0xff]  }
  0x18   :  { %1469 = vmatmul.mubr.msk.f32.gmra.mxu0 %vm161_vm1, %v1161_v28  ;;  %v1204_v14 = vunpack.c.l.bf16 %v1287_v12  ;;  %v1205_v16 = vunpack.c.h.bf16 %v1287_v12  ;;  %v1208_v17 = vunpack.c.l.bf16 %v1288_v15  ;;  %v1209_v19 = vunpack.c.h.bf16 %v1288_v15 }
  0x19   :  { %1471 = vmatprep.mubr.msk.f32.mxu0 %vm161_vm1, %v1164_v30  ;;  %v1212_v20 = vunpack.c.l.bf16 %v1289_v18  ;;  %v1213_v22 = vunpack.c.h.bf16 %v1289_v18  ;;  %v1216_v23 = vunpack.c.l.bf16 %v1290_v21  ;;  %v1217_v25 = vunpack.c.h.bf16 %v1290_v21  ;;  %v1293_v30 = vld [vmem:[%s2043_s0 + $0xa0] sm:$0xff]  }
  0x1a   :  { %1535 = vmatmul.mubr.msk.f32.gmra.mxu1 %vm161_vm1, %v1249_v32  ;;  %v1220_v26 = vunpack.c.l.bf16 %v1291_v24  ;;  %v1221_v28 = vunpack.c.h.bf16 %v1291_v24  ;;  %v1224_v29 = vunpack.c.l.bf16 %v1292_v27  ;;  %v1225_v31 = vunpack.c.h.bf16 %v1292_v27  ;;  %v1885_v27 = vld [vmem:[%s2045_s2] ss:$0 sm:$0xff] }
  0x1b   :  { %1537 = vmatprep.mubr.msk.f32.mxu1 %vm161_vm1, %v1252_v33  ;;  %v1228_v32 = vunpack.c.l.bf16 %v1293_v30  ;;  %v1294_v33 = vld [vmem:[%s2043_s0 + $0xa8] sm:$0xff]   ;;  %v807_v37 = vlaneseq  ;;  %v1602_v43 = vmov 0.00390625   ;;  %vm1604_vm14 = vmmov 0  }
  0x1c   :  { %1472 = vmatmul.mubr.msk.f32.gmra.mxu0 %vm161_vm1, %v1165_v34  ;;  %v1229_v34 = vunpack.c.h.bf16 %v1293_v30  ;;  %v1232_v35 = vunpack.c.l.bf16 %v1294_v33  ;;  %vm983_vm15 = vcmask 261120   ;;  %vm1058_vm0 = vcmask 517120  }
  0x1d   :  { %1474 = vmatprep.mubr.msk.f32.mxu0 %vm161_vm1, %v1168_v36  ;;  %v1233_v36 = vunpack.c.h.bf16 %v1294_v33 }
  0x1e   :  { %1538 = vmatmul.mubr.msk.f32.gmra.mxu1 %vm161_vm1, %v1253_v38  ;;  %v808_v38 = vshrl.u32 %v807_v37, 7 }
  0x1f   :  { %1540 = vmatprep.mubr.msk.f32.mxu1 %vm161_vm1, %v1256_v39  ;;  %v810_v39 = vand.u32 127, %v807_v37 }
  0x20   :  { %1475 = vmatmul.mubr.msk.f32.gmra.mxu0 %vm161_vm1, %v1169_v40  ;;  %v814_v40 = vmul.u32 256, %v808_v38 }
  0x21   :  { %1477 = vmatprep.mubr.msk.f32.mxu0 %vm161_vm1, %v1172_v42  ;;  %v811_v41 = vadd.s32 128, %v810_v39 }
  0x22   :  { %1541 = vmatmul.mubr.msk.f32.gmra.mxu1 %vm161_vm1, %v1257_v44  ;;  %v819_v42 = vadd.s32 256, %v814_v40  ;;  %vm815_vm5 = vcmp.ge.s32.totalorder %v810_v39, %v814_v40 }
  0x23   :  { %1543 = vmatprep.mubr.msk.f32.mxu1 %vm161_vm1, %v1260_v45  ;;  %vm816_vm2 = vcmp.ge.s32.totalorder %v811_v41, %v814_v40  ;;  %v813_v45 = vadd.s32 384, %v810_v39 }
  0x24   :  { %1478 = vmatmul.mubr.msk.f32.gmra.mxu0 %vm161_vm1, %v1173_v46  ;;  %vm821_vm3 = vcmp.lt.s32.totalorder %v811_v41, %v819_v42  ;;  %vm820_vm6 = vcmp.lt.s32.totalorder %v810_v39, %v819_v42  ;;  %v812_v46 = vadd.s32 256, %v810_v39 }
  0x25   :  { %1480 = vmatprep.mubr.msk.f32.mxu0 %vm161_vm1, %v1176_v48  ;;  %vm825_vm4 = vmand %vm816_vm2, %vm821_vm3  ;;  %vm818_vm8 = vcmp.ge.s32.totalorder %v813_v45, %v814_v40  ;;  %vm823_vm9 = vcmp.lt.s32.totalorder %v813_v45, %v819_v42 }
  0x26   :  { %1544 = vmatmul.mubr.msk.f32.gmra.mxu1 %vm161_vm1, %v1261_v50  ;;  %vm1812_vm7 = vmand %vm815_vm5, %vm820_vm6  ;;  %vm817_vm11 = vcmp.ge.s32.totalorder %v812_v46, %v814_v40  ;;  %vm822_vm12 = vcmp.lt.s32.totalorder %v812_v46, %v819_v42 }
  0x27   :  { %1546 = vmatprep.mubr.msk.f32.mxu1 %vm161_vm1, %v1264_v51  ;;  %vm1816_vm10 = vmand %vm818_vm8, %vm823_vm9 }
  0x28   :  { %1481 = vmatmul.mubr.msk.f32.gmra.mxu0 %vm161_vm1, %v1177_v52  ;;  %vm1822_vm13 = vmand %vm817_vm11, %vm822_vm12 }
  0x29   :  { %1483 = vmatprep.mubr.msk.f32.mxu0 %vm161_vm1, %v1180_v54 }
  0x2a   :  { %1547 = vmatmul.mubr.msk.f32.gmra.mxu1 %vm161_vm1, %v1265_v56 }
  0x2b   :  { %1549 = vmatprep.mubr.msk.f32.mxu1 %vm161_vm1, %v1268_v57 }
  0x2c   :  { %1484 = vmatmul.mubr.msk.f32.gmra.mxu0 %vm161_vm1, %v1181_v58 }
  0x2d   :  { %1486 = vmatprep.mubr.msk.f32.mxu0 %vm161_vm1, %v1184_v60 }
  0x2e   :  { %1550 = vmatmul.mubr.msk.f32.gmra.mxu1 %vm161_vm1, %v1269_v62 }
  0x2f   :  { %1552 = vmatprep.mubr.msk.f32.mxu1 %vm161_vm1, %v1272_v63 }
  0x30   :  { %1487 = vmatmul.mubr.msk.f32.gmra.mxu0 %vm161_vm1, %v1185_v0 }
  0x31   :  { %1489 = vmatprep.mubr.msk.f32.mxu0 %vm161_vm1, %v1188_v1 }
  0x32   :  { %1553 = vmatmul.mubr.msk.f32.gmra.mxu1 %vm161_vm1, %v1273_v3 }
  0x33   :  { %1140 = vmatprep.mubr.msk.f32.mxu1 %vm825_vm4, %v1602_v43 }
  0x34   :  { %1490 = vmatmul.mubr.msk.f32.gmra.mxu0 %vm161_vm1, %v1189_v4 }
  0x35   :  { %1492 = vmatprep.mubr.msk.f32.mxu0 %vm161_vm1, %v1192_v5 }
  0x38   :  { %1493 = vmatmul.mubr.msk.f32.gmra.mxu0 %vm161_vm1, %v1193_v7 }
  0x39   :  { %1495 = vmatprep.mubr.msk.f32.mxu0 %vm161_vm1, %v1196_v8 }
  0x3c   :  { %1496 = vmatmul.mubr.msk.f32.gmra.mxu0 %vm161_vm1, %v1197_v10 }
  0x3d   :  { %1498 = vmatprep.mubr.msk.f32.mxu0 %vm161_vm1, %v1200_v11 }
  0x40   :  { %1499 = vmatmul.mubr.msk.f32.gmra.mxu0 %vm161_vm1, %v1201_v13 }
  0x41   :  { %1501 = vmatprep.mubr.msk.f32.mxu0 %vm161_vm1, %v1204_v14 }
  0x44   :  { %1502 = vmatmul.mubr.msk.f32.gmra.mxu0 %vm161_vm1, %v1205_v16 }
  0x45   :  { %1504 = vmatprep.mubr.msk.f32.mxu0 %vm161_vm1, %v1208_v17 }
  0x48   :  { %1505 = vmatmul.mubr.msk.f32.gmra.mxu0 %vm161_vm1, %v1209_v19 }
  0x49   :  { %1507 = vmatprep.mubr.msk.f32.mxu0 %vm161_vm1, %v1212_v20 }
  0x4c   :  { %1508 = vmatmul.mubr.msk.f32.gmra.mxu0 %vm161_vm1, %v1213_v22 }
  0x4d   :  { %1510 = vmatprep.mubr.msk.f32.mxu0 %vm161_vm1, %v1216_v23 }
  0x50   :  { %1511 = vmatmul.mubr.msk.f32.gmra.mxu0 %vm161_vm1, %v1217_v25 }
  0x51   :  { %1513 = vmatprep.mubr.msk.f32.mxu0 %vm161_vm1, %v1220_v26 }
  0x54   :  { %1514 = vmatmul.mubr.msk.f32.gmra.mxu0 %vm161_vm1, %v1221_v28 }
  0x55   :  { %1516 = vmatprep.mubr.msk.f32.mxu0 %vm161_vm1, %v1224_v29 }
  0x58   :  { %1517 = vmatmul.mubr.msk.f32.gmra.mxu0 %vm161_vm1, %v1225_v31 }
  0x59   :  { %1519 = vmatprep.mubr.msk.f32.mxu0 %vm161_vm1, %v1228_v32 }
  0x5c   :  { %1520 = vmatmul.mubr.msk.f32.gmra.mxu0 %vm161_vm1, %v1229_v34 }
  0x5d   :  { %1522 = vmatprep.mubr.msk.f32.mxu0 %vm161_vm1, %v1232_v35 }
  0x60   :  { %1523 = vmatmul.mubr.msk.f32.gmra.mxu0 %vm161_vm1, %v1233_v36 }
  0xcc   :  { %v1820_v48 = vpop.f32.mrf.mxu0 }
  0xce   :  { %v1826_v50 = vpop.f32.mrf.mxu0  ;;  %v1840_v57 = vpop.f32.mrf.mxu1 }
  0xd0   :  { %v1828_v51 = vpop.f32.mrf.mxu0  ;;  %v1846_v60 = vpop.f32.mrf.mxu1 }
  0xd2   :  { %v1830_v52 = vpop.f32.mrf.mxu0  ;;  %v1848_v63 = vpop.f32.mrf.mxu1 }
  0xd4   :  { %v1832_v53 = vpop.f32.mrf.mxu0  ;;  %v1850_v2 = vpop.f32.mrf.mxu1 }
  0xd6   :  { %v1834_v54 = vpop.f32.mrf.mxu0  ;;  %v1852_v5 = vpop.f32.mrf.mxu1 }
  0xd8   :  { %v1836_v55 = vpop.f32.mrf.mxu0  ;;  %v1858_v8 = vpop.f32.mrf.mxu1 }
  0xda   :  { %v1838_v56 = vpop.f32.mrf.mxu0  ;;  %v1864_v11 = vpop.f32.mrf.mxu1 }
  0xdc   :  { %v1842_v58 = vpop.f32.mrf.mxu0  ;;  %v1870_v14 = vpop.f32.mrf.mxu1 }
  0xde   :  { %v1844_v59 = vpop.f32.mrf.mxu0  ;;  %v1874_v17 = vpop.f32.mrf.mxu1 }
  0xe0   :  { %v1476_v61 = vpop.f32.mrf.mxu0  ;;  %v1876_v20 = vpop.f32.mrf.mxu1 }
  0xe2   :  { %v474_v62 = vpop.f32.mrf.mxu0  ;;  %v1878_v23 = vpop.f32.mrf.mxu1 }
  0xe4   :  { %v1479_v0 = vpop.f32.mrf.mxu0  ;;  %v1880_v26 = vpop.f32.mrf.mxu1 }
  0xe5   :  { %v490_v37 = vadd.f32 %v1479_v0, %v1885_v27  ;;  %v480_v0 = vadd.f32 %v1476_v61, %v1885_v27  ;;  %v470_v61 = vadd.f32 %v1842_v58, %v1885_v27 }
  0xe6   :  { %v484_v1 = vpop.f32.mrf.mxu0  ;;  %v1890_v33 = vpop.f32.mrf.mxu1 }
  0xe7   :  { %v485_v42 = vadd.f32 %v1885_v27, %v484_v1  ;;  %v475_v1 = vadd.f32 %v1885_v27, %v474_v62  ;;  %v710_v47 = vadd.f32 %v1890_v33, %v1885_v27 }
  0xe8   :  { %v1482_v3 = vpop.f32.mrf.mxu0  ;;  %v1899_v46 = vpop.f32.mrf.mxu1 }
  0xe9   :  { %v500_v28 = vadd.f32 %v1482_v3, %v1885_v27 }
  0xea   :  { %v494_v4 = vpop.f32.mrf.mxu0 }
  0xeb   :  { %v495_v31 = vadd.f32 %v1885_v27, %v494_v4  ;;  %v758_v38 = vmax.f32 %v500_v28, 0.0  ;;  %v756_v28 = vmax.f32 %v490_v37, 0.0 }
  0xec   :  { %v1854_v6 = vpop.f32.mrf.mxu0 }
  0xed   :  { %v757_v45 = vmax.f32 %v495_v31, 0.0  ;;  %v755_v31 = vmax.f32 %v485_v42, 0.0 }
  0xee   :  { %v1856_v7 = vpop.f32.mrf.mxu0 }
  0xf0   :  { %v1860_v9 = vpop.f32.mrf.mxu0 }
  0xf2   :  { %v1862_v10 = vpop.f32.mrf.mxu0 }
  0xf4   :  { %v1866_v12 = vpop.f32.mrf.mxu0 }
  0xf6   :  { %v1868_v13 = vpop.f32.mrf.mxu0 }
  0xf8   :  { %v1494_v15 = vpop.f32.mrf.mxu0 }
  0xfa   :  { %v1872_v16 = vpop.f32.mrf.mxu0 }
  0xfc   :  { %v1497_v18 = vpop.f32.mrf.mxu0 }
  0xfe   :  { %v544_v19 = vpop.f32.mrf.mxu0 }
  0xff   :  { %v545_v37 = vadd.f32 %v1885_v27, %v544_v19  ;;  %v535_v19 = vadd.f32 %v1885_v27, %v1872_v16  ;;  %v525_v16 = vadd.f32 %v1885_v27, %v1868_v13  ;;  %v515_v13 = vadd.f32 %v1885_v27, %v1862_v10 }
 0x100   :  { %v1500_v21 = vpop.f32.mrf.mxu0  ;;  %v505_v10 = vadd.f32 %v1885_v27, %v1856_v7 }
 0x101   :  { %v560_v4 = vadd.f32 %v1500_v21, %v1885_v27  ;;  %v550_v21 = vadd.f32 %v1497_v18, %v1885_v27  ;;  %v540_v18 = vadd.f32 %v1494_v15, %v1885_v27 }
 0x102   :  { %v554_v22 = vpop.f32.mrf.mxu0 }
 0x103   :  { %v768_v42 = vmax.f32 %v550_v21, 0.0 }
 0x104   :  { %v1503_v24 = vpop.f32.mrf.mxu0 }
 0x105   :  { %v570_v34 = vadd.f32 %v1503_v24, %v1885_v27 }
 0x106   :  { %v564_v25 = vpop.f32.mrf.mxu0 }
 0x107   :  { %v565_v40 = vadd.f32 %v1885_v27, %v564_v25  ;;  %v772_v24 = vmax.f32 %v570_v34, 0.0  ;;  %v555_v25 = vadd.f32 %v1885_v27, %v554_v22  ;;  %v770_v34 = vmax.f32 %v560_v4, 0.0 }
 0x108   :  { %v1506_v29 = vpop.f32.mrf.mxu0  ;;  %v752_v4 = vmax.f32 %v470_v61, 0.0 }
 0x109   :  { %v580_v30 = vadd.f32 %v1506_v29, %v1885_v27  ;;  %v769_v62 = vmax.f32 %v555_v25, 0.0  ;;  %v766_v25 = vmax.f32 %v540_v18, 0.0 }
 0x10a   :  { %v574_v32 = vpop.f32.mrf.mxu0 }
 0x10b   :  { %v774_v35 = vmax.f32 %v580_v30, 0.0  ;;  %v575_v36 = vadd.f32 %v1885_v27, %v574_v32  ;;  %v771_v30 = vmax.f32 %v565_v40, 0.0  ;;  %v1909_v32 = vpop.f32.mrf.mxu1  ;;  %v753_v40 = vmax.f32 %v475_v1, 0.0 }
 0x10c   :  { %v1895_v39 = vpop.f32.mrf.mxu0 }
 0x10d   :  { %v773_v41 = vmax.f32 %v575_v36, 0.0  ;;  %1374 = vmatprep.subr.mxu1 %v774_v35  ;;  %v754_v36 = vmax.f32 %v480_v0, 0.0 }
 0x10e   :  { %1375 = vmatpush3.msra.mxu1 %v758_v38  ;;  %v1901_v3 = vpop.f32.mrf.mxu0  ;;  %v465_v38 = vadd.f32 %v1885_v27, %v1844_v59  ;;  %v455_v59 = vadd.f32 %v1885_v27, %v1838_v56  ;;  %v445_v56 = vadd.f32 %v1885_v27, %v1834_v54  ;;  %v435_v54 = vadd.f32 %v1885_v27, %v1830_v52 }
 0x10f   :  { %1376 = vmatprep.subr.mxu1 %v773_v41  ;;  %v1921_v41 = vpop.f32.mrf.mxu1 }
 0x110   :  { %1377 = vmatpush3.msra.mxu1 %v757_v45  ;;  %v1905_v29 = vpop.f32.mrf.mxu0  ;;  %v460_v45 = vadd.f32 %v1836_v55, %v1885_v27  ;;  %v751_v0 = vmax.f32 %v465_v38, 0.0  ;;  %v450_v55 = vadd.f32 %v1832_v53, %v1885_v27  ;;  %v749_v21 = vmax.f32 %v455_v59, 0.0 }
 0x111   :  { %1378 = vmatprep.subr.mxu1 %v772_v24  ;;  %v767_v24 = vmax.f32 %v545_v37, 0.0  ;;  %v1551_v15 = vpop.f32.mrf.mxu1  ;;  %v440_v53 = vadd.f32 %v1828_v51, %v1885_v27  ;;  %v747_v38 = vmax.f32 %v445_v56, 0.0  ;;  %v430_v51 = vadd.f32 %v1820_v48, %v1885_v27 }
 0x112   :  { %1379 = vmatpush3.msra.mxu1 %v756_v28  ;;  %v1911_v35 = vpop.f32.mrf.mxu0  ;;  %v530_v28 = vadd.f32 %v1866_v12, %v1885_v27  ;;  %v750_v1 = vmax.f32 %v460_v45, 0.0  ;;  %v748_v37 = vmax.f32 %v450_v55, 0.0  ;;  %v660_v48 = vadd.f32 %v1848_v63, %v1885_v27 }
 0x113   :  { %1380 = vmatprep.subr.mxu1 %v771_v30  ;;  %v724_v12 = vpop.f32.mrf.mxu1  ;;  %v746_v45 = vmax.f32 %v440_v53, 0.0  ;;  %v650_v56 = vadd.f32 %v1840_v57, %v1885_v27  ;;  %v720_v57 = vadd.f32 %v1909_v32, %v1885_v27  ;;  %v715_v44 = vadd.f32 %v1885_v27, %v1921_v41 }
 0x114   :  { %1381 = vmatpush3.msra.mxu1 %v755_v31  ;;  %v1916_v22 = vpop.f32.mrf.mxu0  ;;  %v765_v31 = vmax.f32 %v535_v19, 0.0  ;;  %v764_v61 = vmax.f32 %v530_v28, 0.0  ;;  %v425_v19 = vadd.f32 %v1885_v27, %v1826_v50  ;;  %v744_v28 = vmax.f32 %v430_v51, 0.0 }
 0x115   :  { %1382 = vmatprep.subr.mxu1 %v770_v34  ;;  %v520_v34 = vadd.f32 %v1860_v9, %v1885_v27  ;;  %v1554_v9 = vpop.f32.mrf.mxu1  ;;  %v655_v50 = vadd.f32 %v1885_v27, %v1850_v2  ;;  %v725_v63 = vadd.f32 %v1885_v27, %v724_v12  ;;  %v645_v2 = vadd.f32 %v1885_v27, %v1846_v60 }
 0x116   :  { %1383 = vmatpush3.msra.mxu1 %v754_v36  ;;  %v1924_v58 = vpop.f32.mrf.mxu0  ;;  %v740_v52 = vadd.f32 %v1554_v9, %v1885_v27  ;;  %v705_v9 = vadd.f32 %v1885_v27, %v1899_v46  ;;  %v700_v51 = vadd.f32 %v1878_v23, %v1885_v27  ;;  %v690_v23 = vadd.f32 %v1874_v17, %v1885_v27 }
 0x117   :  { %1384 = vmatprep.subr.mxu1 %v769_v62  ;;  %v763_v62 = vmax.f32 %v525_v16, 0.0  ;;  %v762_v18 = vmax.f32 %v520_v34, 0.0  ;;  %v730_v16 = vadd.f32 %v1551_v15, %v1885_v27  ;;  %v803_v60 = vmax.f32 %v725_v63, 0.0 }
 0x118   :  { %1385 = vmatpush3.msra.mxu1 %v753_v40  ;;  %v1934_v30 = vpop.f32.mrf.mxu0  ;;  %v510_v40 = vadd.f32 %v1854_v6, %v1885_v27  ;;  %v734_v6 = vpop.f32.mrf.mxu1  ;;  %v806_v7 = vmax.f32 %v740_v52, 0.0  ;;  %v799_v46 = vmax.f32 %v705_v9, 0.0  ;;  %v680_v17 = vadd.f32 %v1864_v11, %v1885_v27 }
 0x119   :  { %1386 = vmatprep.subr.mxu1 %v768_v42  ;;  %v735_v55 = vadd.f32 %v1885_v27, %v734_v6  ;;  %v804_v12 = vmax.f32 %v730_v16, 0.0  ;;  %v620_v33 = vadd.f32 %v1934_v30, %v1885_v27  ;;  %v610_v30 = vadd.f32 %v1916_v22, %v1885_v27 }
 0x11a   :  { %1387 = vmatpush3.msra.mxu1 %v752_v4  ;;  %v1944_v36 = vpop.f32.mrf.mxu0  ;;  %v761_v4 = vmax.f32 %v515_v13, 0.0  ;;  %v760_v59 = vmax.f32 %v510_v40, 0.0  ;;  %v787_v13 = vmax.f32 %v645_v2, 0.0  ;;  %v801_v40 = vmax.f32 %v715_v44, 0.0 }
 0x11b   :  { %1388 = vmatprep.subr.mxu1 %v767_v24  ;;  %v745_v24 = vmax.f32 %v435_v54, 0.0  ;;  %v805_v34 = vmax.f32 %v735_v55, 0.0  ;;  %v600_v22 = vadd.f32 %v1905_v29, %v1885_v27  ;;  %v670_v11 = vadd.f32 %v1852_v5, %v1885_v27 }
 0x11c   :  { %1389 = vmatpush3.msra.mxu1 %v751_v0  ;;  %v1521_v42 = vpop.f32.mrf.mxu0  ;;  %v590_v29 = vadd.f32 %v1895_v39, %v1885_v27  ;;  %v974_v39 = vld [vmem:[%s2046_s3 + $0x10] sm:$0xff] }
 0x11d   :  { %1390 = vmatprep.subr.mxu1 %v766_v25  ;;  %v759_v25 = vmax.f32 %v505_v10, 0.0  ;;  %v630_v32 = vadd.f32 %v1521_v42, %v1885_v27  ;;  %v695_v42 = vadd.f32 %v1885_v27, %v1880_v26  ;;  %v685_v26 = vadd.f32 %v1885_v27, %v1876_v20 }
 0x11e   :  { %1391 = vmatpush3.msra.mxu1 %v750_v1  ;;  %v624_v0 = vpop.f32.mrf.mxu0  ;;  %v743_v1 = vmax.f32 %v425_v19, 0.0  ;;  %v798_v19 = vmax.f32 %v700_v51, 0.0  ;;  %v675_v20 = vadd.f32 %v1885_v27, %v1870_v14  ;;  %v778_v55 = vmax.f32 %v600_v22, 0.0 }
 0x11f   :  { %1392 = vmatprep.subr.mxu1 %v765_v31  ;;  %v625_v41 = vadd.f32 %v1885_v27, %v624_v0  ;;  %v784_v10 = vmax.f32 %v630_v32, 0.0  ;;  %v797_v6 = vmax.f32 %v695_v42, 0.0  ;;  %v796_v0 = vmax.f32 %v690_v23, 0.0 }
 0x120   :  { %1393 = vmatpush3.msra.mxu1 %v749_v21  ;;  %v1524_v31 = vpop.f32.mrf.mxu0  ;;  %v790_v21 = vmax.f32 %v660_v48, 0.0  ;;  %v795_v48 = vmax.f32 %v685_v26, 0.0  ;;  %v665_v14 = vadd.f32 %v1885_v27, %v1858_v8  ;;  %v792_v16 = vmax.f32 %v670_v11, 0.0 }
 0x121   :  { %1394 = vmatprep.subr.mxu1 %v764_v61  ;;  %v789_v61 = vmax.f32 %v655_v50, 0.0  ;;  %v640_v15 = vadd.f32 %v1524_v31, %v1885_v27  ;;  %v783_v52 = vmax.f32 %v625_v41, 0.0  ;;  %v776_v5 = vmax.f32 %v590_v29, 0.0 }
 0x122   :  { %1395 = vmatpush3.msra.mxu1 %v748_v37  ;;  %v634_v53 = vpop.f32.mrf.mxu0  ;;  %v788_v37 = vmax.f32 %v650_v56, 0.0  ;;  %v791_v31 = vmax.f32 %v665_v14, 0.0  ;;  %v1603_v8 = vmov 0.0  }
 0x123   :  { %1396 = vmatprep.subr.mxu1 %v763_v62  ;;  %v786_v62 = vmax.f32 %v640_v15, 0.0  ;;  %v635_v54 = vadd.f32 %v1885_v27, %v634_v53 }
 0x124   :  { %1397 = vmatpush3.msra.mxu1 %v747_v38  ;;  %v802_v38 = vmax.f32 %v720_v57, 0.0  ;;  %v1144_v57 = vld [vmem:[%s2047_s4] ss:$0 sm:$0xff] }
 0x125   :  { %1398 = vmatprep.subr.mxu1 %v762_v18  ;;  %v785_v18 = vmax.f32 %v635_v54, 0.0 }
 0x126   :  { %1399 = vmatpush3.msra.mxu1 %v746_v45  ;;  %v800_v45 = vmax.f32 %v710_v47, 0.0 }
 0x127   :  { %1400 = vmatprep.subr.mxu1 %v761_v4  ;;  %v615_v4 = vadd.f32 %v1885_v27, %v1944_v36  ;;  %v605_v36 = vadd.f32 %v1885_v27, %v1924_v58  ;;  %v595_v58 = vadd.f32 %v1885_v27, %v1911_v35  ;;  %v585_v35 = vadd.f32 %v1885_v27, %v1901_v3  ;;  %v975_v27 = vld [vmem:[%s2046_s3 + $0x18] sm:$0xff]  ;;  %v973_v3 = vld [vmem:[%s2046_s3 + $0x8] sm:$0xff] }
 0x128   :  { %1401 = vmatpush3.msra.mxu1 %v745_v24  ;;  %v782_v24 = vmax.f32 %v620_v33, 0.0 }
 0x129   :  { %1402 = vmatprep.subr.mxu1 %v760_v59  ;;  %v781_v59 = vmax.f32 %v615_v4, 0.0  ;;  %v777_v50 = vmax.f32 %v595_v58, 0.0  ;;  %v775_v56 = vmax.f32 %v585_v35, 0.0 }
 0x12a   :  { %1403 = vmatpush3.msra.mxu1 %v744_v28  ;;  %v780_v28 = vmax.f32 %v610_v30, 0.0 }
 0x12b   :  { %1404 = vmatprep.subr.mxu1 %v759_v25  ;;  %v779_v25 = vmax.f32 %v605_v36, 0.0 }
 0x12c   :  { %1405 = vmatpush3.msra.mxu1 %v743_v1  ;;  %v793_v1 = vmax.f32 %v675_v20, 0.0 }
 0x12d   :  { %1409 = vmatprep.subr.mxu1 %v806_v7  ;;  %1141 = vmatmul.mubr.msk.f32.vlgmr.msra.gmra.mxu1 %vm1812_vm7, %v1602_v43  ;;  %v794_v7 = vmax.f32 %v680_v17, 0.0 }
 0x12e   :  { %1410 = vmatpush3.msra.mxu1 %v790_v21  ;;  %1142 = vmatprep.mubr.msk.f32.mxu1 %vm1816_vm10, %v1602_v43 }
 0x12f   :  { %1411 = vmatprep.subr.mxu1 %v805_v34 }
 0x130   :  { %1412 = vmatpush3.msra.mxu1 %v789_v61 }
 0x131   :  { %1413 = vmatprep.subr.mxu1 %v804_v12 }
 0x132   :  { %1414 = vmatpush3.msra.mxu1 %v788_v37 }
 0x133   :  { %1415 = vmatprep.subr.mxu1 %v803_v60 }
 0x134   :  { %1416 = vmatpush3.msra.mxu1 %v787_v13 }
 0x135   :  { %1417 = vmatprep.subr.mxu1 %v802_v38 }
 0x136   :  { %1418 = vmatpush3.msra.mxu1 %v786_v62 }
 0x137   :  { %1419 = vmatprep.subr.mxu1 %v801_v40 }
 0x138   :  { %1420 = vmatpush3.msra.mxu1 %v785_v18 }
 0x139   :  { %1421 = vmatprep.subr.mxu1 %v800_v45 }
 0x13a   :  { %1422 = vmatpush3.msra.mxu1 %v784_v10 }
 0x13b   :  { %1423 = vmatprep.subr.mxu1 %v799_v46 }
 0x13c   :  { %1424 = vmatpush3.msra.mxu1 %v783_v52 }
 0x13d   :  { %1425 = vmatprep.subr.mxu1 %v798_v19 }
 0x13e   :  { %1426 = vmatpush3.msra.mxu1 %v782_v24 }
 0x13f   :  { %1427 = vmatprep.subr.mxu1 %v797_v6 }
 0x140   :  { %1428 = vmatpush3.msra.mxu1 %v781_v59 }
 0x141   :  { %1429 = vmatprep.subr.mxu1 %v796_v0 }
 0x142   :  { %1430 = vmatpush3.msra.mxu1 %v780_v28 }
 0x143   :  { %1431 = vmatprep.subr.mxu1 %v795_v48 }
 0x144   :  { %1432 = vmatpush3.msra.mxu1 %v779_v25 }
 0x145   :  { %1433 = vmatprep.subr.mxu1 %v794_v7 }
 0x146   :  { %1434 = vmatpush3.msra.mxu1 %v778_v55 }
 0x147   :  { %1435 = vmatprep.subr.mxu1 %v793_v1 }
 0x148   :  { %1436 = vmatpush3.msra.mxu1 %v777_v50 }
 0x149   :  { %1437 = vmatprep.subr.mxu1 %v792_v16 }
 0x14a   :  { %1438 = vmatpush3.msra.mxu1 %v776_v5 }
 0x14b   :  { %1439 = vmatprep.subr.mxu1 %v791_v31 }
 0x14c   :  { %1440 = vmatpush3.msra.mxu1 %v775_v56 }
 0x14d   :  { %1143 = vmatmul.mubr.msk.f32.vlgmr.msra.gmra.mxu1 %vm1822_vm13, %v1602_v43  ;;  %1555 = vmatprep.subr.mxu1 %v1603_v8  ;;  %v972_v43 = vld [vmem:[%s2046_s3] sm:$0xff]  ;;  %s1580_s3 = scalar_lea.vmem %s1067_s25, 32 }
 0x14e   :  { %1556 = vmatpush3.msra.mxu1 %v975_v27  ;;  %1563 = vmatprep.mubr.msk.f32.mxu1 %vm1604_vm14, %v1603_v8  ;;  %p1581_p0 = scmp.ne.s32.totalorder %s1067_s25, %s1580_s3  ;;  %p1586_p2 = scmp.lt.s32.totalorder %s1580_s3, %s1580_s3 }
 0x14f   :  { %1557 = vmatprep.subr.mxu1 %v1603_v8 }
 0x150   :  { %1558 = vmatpush3.msra.mxu1 %v974_v39  ;;  %p1587_p3 = por %p1586_p2, %p1585_p1 }
 0x151   :  { %1559 = vmatprep.subr.mxu1 %v1603_v8 }
 0x152   :  { %1560 = vmatpush3.msra.mxu1 %v973_v3  ;;  %p1588_p4 = pnand %p1587_p3, %p1581_p0 }
 0x153   :  { %1561 = vmatprep.subr.mxu1 %v1603_v8 }
 0x154   :  { %1562 = vmatpush3.msra.mxu1 %v972_v43 }
 0x1ed   :  { %v1406_v49 = vpop.f32.mrf.mxu1 }
 0x1ef   :  { %v1407_v21 = vpop.f32.mrf.mxu1 }
 0x1f0   :  { %v1408_v2 = vadd.f32 %v1407_v21, %v1406_v49 }
 0x20d   :  { %v1441_v63 = vpop.f32.mrf.mxu1 }
 0x20f   :  { %v1442_v34 = vpop.f32.mrf.mxu1 }
 0x210   :  { %v1443_v61 = vadd.f32 %v1442_v34, %v1441_v63 }
 0x212   :  { %v969_v15 = vadd.f32 %v1443_v61, %v1408_v2 }
 0x214   :  { %1564 = vmatmul.mubr.msk.f32.vlgmr.msra.gmra.mxu1 %vm983_vm15, %v969_v15 }
 0x2d4   :  { %v1053_v12 = vpop.f32.mrf.mxu1 }
 0x2d5   :  { %v1054_v53 = vadd.f32 %v1144_v57, %v1053_v12 }
 0x2d6   :  { %v1565_v37 = vpop.f32.mrf.mxu1 }
 0x2d7   :  { %v1057_v44 = vmax.f32 %v1054_v53, 0.0 }
 0x2d9   :  { %1059 = vst.msk [vmem:[#allocation2] sm:$0x3] %vm1058_vm0, %v1057_v44 }
 0x2da   :  { %1591 = shalt.err (!%p1588_p4)
}
 0x2db   :  { %1069 = dma.vmem_to_hbm [thread:$0]  %s1067_s25, 32, %s2048_s5, [#allocation3]  }
 0x2dc   :  { %1600 = dma.done.wait [#allocation3], 32  }
 0x2dd   :  { %1601 = vsyncadd [#allocation3], 4294967264 }
 0x2de   :  { %1073 = vsyncpa [#allocation3], 1 }

</bundles_post_ra>
